<compile_context>
chip_gen: v7x
topology: tpu7x:2x2x1
jax: 0.10.0
libtpu: 0.0.40
codegen_flags: <defaults>
</compile_context>

<pallas_src>
import jax
import jax.numpy as jnp
from jax.experimental import pallas as pl
from jax.experimental.pallas import tpu as pltpu

LANES = 128                    # vreg lane width (last dim of the slab)
SUB = 8                        # sublane granularity for block rows / output
BLOCK_BYTES = 2 * 1024 * 1024  # target HBM bytes per input per grid step


def _round_up(x: int, m: int) -> int:
    return -(-x // m) * m


def _num_tensorcores() -> int:
    """2 on v7x (2 TensorCores per chip), 1 on v5e/v6e and as a safe default."""
    try:
        kind = jax.devices()[0].device_kind.lower()
    except Exception:
        return 1
    return 2 if "v7" in kind else 1


def _make_mse_kernel(rows: int, tm: int, bpc: int, need_mask: bool):
    """rows: valid rows of the (rows, 128) slab; tm: rows per block;
    bpc: blocks per core (inner grid extent); need_mask: a partial tail block
    and/or phantom (per-core padding) blocks exist."""
    full_blocks = rows // tm   # number of blocks that are entirely valid

    def mse_kernel(yp_ref, yt_ref, out_ref, acc_ref):
        i = pl.program_id(1)

        @pl.when(i == 0)
        def _():
            acc_ref[...] = jnp.zeros_like(acc_ref)

        # Native-dtype DMA; cast to f32 on the VPU in-kernel.
        d = yp_ref[...].astype(jnp.float32) - yt_ref[...].astype(jnp.float32)
        sq = d * d

        if need_mask:
            c = pl.program_id(0)
            g = c * bpc + i                    # logical global block index

            @pl.when(g < full_blocks)
            def _():
                # Bulk steps: mask-free pure elementwise accumulate.
                acc_ref[...] += sq

            @pl.when(g >= full_blocks)
            def _():
                # Partial tail block or phantom block (clamped index_map
                # re-reads the last real block): zero out invalid rows.
                # int32 row ids are fine for n < ~2.7e11 elements.
                row_ids = g * tm + jax.lax.broadcasted_iota(
                    jnp.int32, (tm, LANES), 0)
                acc_ref[...] += jnp.where(row_ids < rows, sq, 0.0)
        else:
            acc_ref[...] += sq

        @pl.when(i == pl.num_programs(1) - 1)
        def _():
            # Single cross-lane/sublane reduce per core, broadcast into a
            # lane-dense (8,128) output block (unmasked vst).
            out_ref[...] = jnp.full((SUB, LANES), jnp.sum(acc_ref[...]),
                                    jnp.float32)

    return mse_kernel


def mse_loss(y_pred, y_true):
    assert y_pred.shape == y_true.shape
    n = y_pred.size                     # mean denominator (real elements only)
    if n == 0:
        return jnp.float32(jnp.nan)     # torch.mean of empty is nan

    yp = jnp.ravel(y_pred)              # contiguous reshape: no copy
    yt = jnp.ravel(y_true)

    n_tail = n % LANES                  # < 128 leftover elements
    n_bulk = n - n_tail

    if n_tail:
        tp = yp[n_bulk:].astype(jnp.float32)
        tt = yt[n_bulk:].astype(jnp.float32)
        tail_sum = jnp.sum((tp - tt) ** 2)
    else:
        tail_sum = jnp.float32(0.0)

    if n_bulk == 0:
        return tail_sum / n

    rows = n_bulk // LANES
    yp_b = (yp[:n_bulk] if n_tail else yp).reshape(rows, LANES)
    yt_b = (yt[:n_bulk] if n_tail else yt).reshape(rows, LANES)

    # ~2 MiB of HBM per input per grid step regardless of dtype (bf16/fp8
    # inputs get proportionally more rows so bytes/step stay at the f32 level).
    itemsize = max(yp_b.dtype.itemsize, yt_b.dtype.itemsize)
    tm_max = max(SUB, BLOCK_BYTES // (LANES * itemsize))   # f32: 4096 rows
    tm = min(tm_max, _round_up(rows, SUB))                 # multiple of 8

    total_blocks = -(-rows // tm)
    ncores = _num_tensorcores()
    bpc = -(-total_blocks // ncores)                       # blocks per core
    need_mask = (total_blocks * tm != rows) or (ncores * bpc != total_blocks)

    def in_map(c, i):
        g = c * bpc + i
        # Clamp so phantom blocks (g >= total_blocks) never issue an OOB DMA;
        # their (re-read) data is zeroed by the in-kernel mask.
        return (jnp.minimum(g, total_blocks - 1), 0)

    cost = pl.CostEstimate(
        flops=3 * n_bulk,
        transcendentals=0,
        bytes_accessed=int(
            n_bulk * (yp_b.dtype.itemsize + yt_b.dtype.itemsize)
            + ncores * SUB * LANES * 4),
    )

    out = pl.pallas_call(
        _make_mse_kernel(rows, tm, bpc, need_mask),
        out_shape=jax.ShapeDtypeStruct((ncores * SUB, LANES), jnp.float32),
        grid_spec=pltpu.PrefetchScalarGridSpec(
            num_scalar_prefetch=0,
            grid=(ncores, bpc),
            in_specs=[
                pl.BlockSpec((tm, LANES), in_map),
                pl.BlockSpec((tm, LANES), in_map),
            ],
            out_specs=pl.BlockSpec((SUB, LANES), lambda c, i: (c, 0)),
            scratch_shapes=[pltpu.VMEM((tm, LANES), jnp.float32)],
        ),
        compiler_params=pltpu.CompilerParams(
            dimension_semantics=("parallel", "arbitrary"),
        ),
        cost_estimate=cost,
    )(yp_b, yt_b)

    # One broadcast-filled (8,128) block per core -> take one element each.
    bulk_sum = jnp.sum(out[::SUB, 0])
    return (bulk_sum + tail_sum) / n


if __name__ == "__main__":
    key = jax.random.PRNGKey(0)
    k1, k2 = jax.random.split(key)

    # Dense prediction target (NCHW); element count is a multiple of 128:
    # zero-copy reshape, mask-free bulk path.
    x_shape = (2, 4, 16, 16)
    y_pred = jax.random.normal(k1, x_shape, dtype=jnp.float32)
    y_true = jax.random.normal(k2, x_shape, dtype=jnp.float32)

    loss = mse_loss(y_pred, y_true)
    jax.block_until_ready(loss)
    ref = jnp.mean((y_pred - y_true) ** 2)
    assert jnp.allclose(loss, ref, rtol=1e-5, atol=1e-6), (loss, ref)

    # Unaligned element count (1155 = 9*128 + 3): exercises the pl.when-gated
    # masked edge block plus the tiny wrapper-side tail (no pad, no full-array
    # copy).
    z_shape = (3, 5, 7, 11)
    k3, k4 = jax.random.split(k1)
    zp = jax.random.normal(k3, z_shape, dtype=jnp.float32)
    zt = jax.random.normal(k4, z_shape, dtype=jnp.float32)
    loss2 = mse_loss(zp, zt)
    jax.block_until_ready(loss2)
    ref2 = jnp.mean((zp - zt) ** 2)
    assert jnp.allclose(loss2, ref2, rtol=1e-5, atol=1e-6), (loss2, ref2)

    print("KERNEL_OK")
</pallas_src>

<mosaic_0001>
module attributes {stable_mosaic.version = 11 : i64} {
  func.func @mse_kernel(%arg0: i32, %arg1: i32, %arg2: memref<16x128xf32, #tpu.memory_space<vmem>>, %arg3: memref<16x128xf32, #tpu.memory_space<vmem>>, %arg4: memref<8x128xf32, #tpu.memory_space<vmem>>, %arg5: memref<16x128xf32, #tpu.memory_space<vmem>>) attributes {dimension_semantics = [#tpu.dimension_semantics<parallel>, #tpu.dimension_semantics<arbitrary>], iteration_bounds = array<i64: 1, 1>, scalar_prefetch = 0 : i64, scratch_operands = 1 : i64, tpu.core_type = #tpu.core_type<tc>, window_params = [{transform_indices = @transform_0, window_bounds = array<i64: 16, 128>}, {transform_indices = @transform_1, window_bounds = array<i64: 16, 128>}, {transform_indices = @transform_2, window_bounds = array<i64: 8, 128>}]} {
    %c0_i32 = arith.constant 0 : i32
    %0 = arith.cmpi eq, %arg1, %c0_i32 : i32
    %1 = arith.extui %0 : i1 to i32
    %c0_i32_0 = arith.constant 0 : i32
    %2 = arith.cmpi ne, %1, %c0_i32_0 : i32
    scf.if %2 {
      %cst = arith.constant 0.000000e+00 : f32
      %13 = vector.broadcast %cst : f32 to vector<16x128xf32>
      %c0_10 = arith.constant 0 : index
      %c0_11 = arith.constant 0 : index
      %14 = vector.load %arg5[%c0_10, %c0_11] : memref<16x128xf32, #tpu.memory_space<vmem>>, vector<16x128xf32>
      tpu.vector_store %arg5[%c0_10, %c0_11], %13 {strides = array<i32>} : memref<16x128xf32, #tpu.memory_space<vmem>>, vector<16x128xf32>,
    } else {
    }
    %c0 = arith.constant 0 : index
    %c0_1 = arith.constant 0 : index
    %3 = vector.load %arg2[%c0, %c0_1] : memref<16x128xf32, #tpu.memory_space<vmem>>, vector<16x128xf32>
    %c0_2 = arith.constant 0 : index
    %c0_3 = arith.constant 0 : index
    %4 = vector.load %arg3[%c0_2, %c0_3] : memref<16x128xf32, #tpu.memory_space<vmem>>, vector<16x128xf32>
    %5 = arith.subf %3, %4 : vector<16x128xf32>
    %6 = arith.mulf %5, %5 : vector<16x128xf32>
    %c0_4 = arith.constant 0 : index
    %c0_5 = arith.constant 0 : index
    %7 = vector.load %arg5[%c0_4, %c0_5] : memref<16x128xf32, #tpu.memory_space<vmem>>, vector<16x128xf32>
    %8 = arith.addf %7, %6 : vector<16x128xf32>
    %c0_6 = arith.constant 0 : index
    %c0_7 = arith.constant 0 : index
    %9 = vector.load %arg5[%c0_6, %c0_7] : memref<16x128xf32, #tpu.memory_space<vmem>>, vector<16x128xf32>
    tpu.vector_store %arg5[%c0_6, %c0_7], %8 {strides = array<i32>} : memref<16x128xf32, #tpu.memory_space<vmem>>, vector<16x128xf32>,
    %c0_i32_8 = arith.constant 0 : i32
    %10 = arith.cmpi eq, %arg1, %c0_i32_8 : i32
    %11 = arith.extui %10 : i1 to i32
    %c0_i32_9 = arith.constant 0 : i32
    %12 = arith.cmpi ne, %11, %c0_i32_9 : i32
    scf.if %12 {
      %c0_10 = arith.constant 0 : index
      %c0_11 = arith.constant 0 : index
      %13 = vector.load %arg5[%c0_10, %c0_11] : memref<16x128xf32, #tpu.memory_space<vmem>>, vector<16x128xf32>
      %14 = vector.shape_cast %13 : vector<16x128xf32> to vector<1x16x128xf32>
      %cst = arith.constant dense<0.000000e+00> : vector<1xf32>
      %15 = vector.multi_reduction <add>, %14, %cst [1, 2] : vector<1x16x128xf32> to vector<1xf32>
      %16 = vector.shape_cast %15 : vector<1xf32> to vector<1x1x1xf32>
      %17 = vector.extract %16[0, 0, 0] : f32 from vector<1x1x1xf32>
      %18 = vector.broadcast %17 : f32 to vector<8x128xf32>
      %c0_12 = arith.constant 0 : index
      %c0_13 = arith.constant 0 : index
      %19 = vector.load %arg4[%c0_12, %c0_13] : memref<8x128xf32, #tpu.memory_space<vmem>>, vector<8x128xf32>
      tpu.vector_store %arg4[%c0_12, %c0_13], %18 {strides = array<i32>} : memref<8x128xf32, #tpu.memory_space<vmem>>, vector<8x128xf32>,
    } else {
    }
    return
  }
  func.func @transform_0(%arg0: i32, %arg1: i32) -> (i32, i32) {
    %c1_i32 = arith.constant 1 : i32
    %0 = arith.muli %arg0, %c1_i32 : i32
    %1 = arith.addi %0, %arg1 : i32
    %c0_i32 = arith.constant 0 : i32
    %2 = arith.minsi %1, %c0_i32 : i32
    %c0_i32_0 = arith.constant 0 : i32
    %c0_i32_1 = arith.constant 0 : i32
    return %2, %c0_i32_0 : i32, i32
  }
  func.func @transform_1(%arg0: i32, %arg1: i32) -> (i32, i32) {
    %c1_i32 = arith.constant 1 : i32
    %0 = arith.muli %arg0, %c1_i32 : i32
    %1 = arith.addi %0, %arg1 : i32
    %c0_i32 = arith.constant 0 : i32
    %2 = arith.minsi %1, %c0_i32 : i32
    %c0_i32_0 = arith.constant 0 : i32
    %c0_i32_1 = arith.constant 0 : i32
    return %2, %c0_i32_0 : i32, i32
  }
  func.func @transform_2(%arg0: i32, %arg1: i32) -> (i32, i32) {
    %c0_i32 = arith.constant 0 : i32
    %c0_i32_0 = arith.constant 0 : i32
    return %arg0, %c0_i32 : i32, i32
  }
}

</mosaic_0001>

<bundles_post_ra>
// kernel: tpu_custom_call.1
= control target key start
LH: loop header
LB: loop body
LE: loop exit
PB: predicated region body
PF: predicated region fallthrough
CT: control target
= control target key end

     0   :  { %7 = vsyncpa [#allocation4], 0  ;;  %s252_s0 = inlined_call_operand.hbm [shape: f32[16,128], index: 0, kind: input, shape index: {}]   ;;  %s253_s1 = inlined_call_operand.hbm [shape: f32[16,128], index: 1, kind: input, shape index: {}]   ;;  %s254_s2 = inlined_call_operand.hbm [shape: f32[8,128], index: 2, kind: output, shape index: {}]  }
   0x1   :  { %8 = vsyncpa [#allocation7], 0 }
   0x2   :  { %9 = vsyncpa [#allocation5], 0  ;;  %s196_s9 = smov [#allocation3]   ;;  %s124_s13 = scalar_lea.hbm %s252_s0, 256 }
   0x3   :  { %s21_s10 = sshll.u32 %s196_s9, 4  ;;  %p125_p0 = scmp.ne.s32.totalorder %s252_s0, %s124_s13  ;;  %s22_s10 = int_to_ptr.vmem [resolvable:$true] %s21_s10 }
   0x4   :  { %p128_p1 = scmp.lt.u32.totalorder %s124_s13, %s252_s0 }
   0x6   :  { %p130_p2 = pnand %p128_p1, %p125_p0 }
   0x8   :  { %133 = shalt.err (!%p130_p2)
}
   0x9   :  { %s134_s18 = scalar_lea.vmem %s22_s10, 256  ;;  %p139_p4 = scmp.lt.s32.totalorder %s22_s10, %s22_s10 }
   0xa   :  { %p135_p3 = scmp.ne.s32.totalorder %s22_s10, %s134_s18  ;;  %p140_p5 = scmp.lt.s32.totalorder %s134_s18, %s134_s18 }
   0xc   :  { %p141_p6 = por %p140_p5, %p139_p4 }
   0xe   :  { %p142_p7 = pnand %p141_p6, %p135_p3 }
  0x10   :  { %145 = shalt.err (!%p142_p7)
}
  0x11   :  { %s197_s19 = smov 128   ;;  %s198_s20 = smov 8  }
  0x12   :  { %27 = dma.hbm_to_vmem [thread:$0]  %s252_s0, 256, %s22_s10, [#allocation4], %s197_s19, %s197_s19, %s198_s20  }
  0x13   :  { %s199_s23 = smov [#allocation6]   ;;  %s146_s27 = scalar_lea.hbm %s253_s1, 256 }
  0x14   :  { %s39_s24 = sshll.u32 %s199_s23, 4  ;;  %p147_p8 = scmp.ne.s32.totalorder %s253_s1, %s146_s27  ;;  %s40_s24 = int_to_ptr.vmem [resolvable:$true] %s39_s24 }
  0x15   :  { %p150_p9 = scmp.lt.u32.totalorder %s146_s27, %s253_s1 }
  0x17   :  { %p152_p10 = pnand %p150_p9, %p147_p8 }
  0x19   :  { %155 = shalt.err (!%p152_p10)
}
  0x1a   :  { %s156_s4 = scalar_lea.vmem %s40_s24, 256  ;;  %p161_p12 = scmp.lt.s32.totalorder %s40_s24, %s40_s24 }
  0x1b   :  { %p157_p11 = scmp.ne.s32.totalorder %s40_s24, %s156_s4  ;;  %p162_p13 = scmp.lt.s32.totalorder %s156_s4, %s156_s4 }
  0x1d   :  { %p163_p0 = por %p162_p13, %p161_p12 }
  0x1f   :  { %p164_p1 = pnand %p163_p0, %p157_p11 }
  0x21   :  { %167 = shalt.err (!%p164_p1)
}
  0x22   :  { %45 = dma.hbm_to_vmem [thread:$0]  %s253_s1, 256, %s40_s24, [#allocation7], %s197_s19, %s197_s19, %s198_s20  }
  0x23   :  { %190 = dma.done.wait [#allocation4], 256  }
  0x24   :  { %191 = vsyncadd [#allocation4], 4294967040 }
  0x25   :  { %192 = dma.done.wait [#allocation7], 256  }
  0x26   :  { %193 = vsyncadd [#allocation7], 4294967040  ;;  %v66_v0 = vld [vmem:[#allocation3] sm:$0xff]  ;;  %v67_v1 = vld [vmem:[#allocation3 + $0x8] sm:$0xff]  ;;  %s200_s1 = smov [#allocation8]  }
  0x27   :  { %v68_v2 = vld [vmem:[#allocation6] sm:$0xff]  ;;  %v69_v3 = vld [vmem:[#allocation6 + $0x8] sm:$0xff]  ;;  %s103_s6 = sshll.u32 %s200_s1, 4  ;;  %s104_s6 = int_to_ptr.vmem [resolvable:$true] %s103_s6 }
  0x28   :  { %v70_v4 = vsub.f32 %v66_v0, %v68_v2  ;;  %v71_v5 = vsub.f32 %v67_v1, %v69_v3  ;;  %s168_s8 = scalar_lea.vmem %s104_s6, 128  ;;  %p173_p3 = scmp.lt.s32.totalorder %s104_s6, %s104_s6 }
  0x29   :  { %p169_p2 = scmp.ne.s32.totalorder %s104_s6, %s168_s8  ;;  %p174_p4 = scmp.lt.s32.totalorder %s168_s8, %s168_s8 }
  0x2a   :  { %v72_v6 = vmul.f32 %v70_v4, %v70_v4  ;;  %v73_v7 = vmul.f32 %v71_v5, %v71_v5 }
  0x2b   :  { %p175_p5 = por %p174_p4, %p173_p3 }
  0x2c   :  { %v85_v8 = vadd.f32 %v73_v7, %v72_v6 }
  0x2d   :  { %p176_p6 = pnand %p175_p5, %p169_p2 }
  0x2e   :  { %86 = vadd.xlane.f32.xlu0 %v85_v8 }
  0xbb   :  { %v87_v9 = vpop.xlane.xlu0 %86 }
  0xbc   :  { %v88_v10 = vrot.slane %v87_v9, 4 }
  0xbe   :  { %v89_v11 = vadd.f32 %v88_v10, %v87_v9 }
  0xc0   :  { %v90_v12 = vrot.slane %v89_v11, 2 }
  0xc2   :  { %v91_v13 = vadd.f32 %v90_v12, %v89_v11 }
  0xc4   :  { %v92_v14 = vrot.slane %v91_v13, 1 }
  0xc6   :  { %v93_v15 = vadd.f32 %v92_v14, %v91_v13 }
  0xc8   :  { %117 = vpush %v93_v15 }
  0xf9   :  { %s118_s7 = spop %117 }
  0xfa   :  { %v95_v16 = vstv %s118_s7 }
  0xfb   :  { %96 = vst [vmem:[#allocation8] sm:$0xff] %v95_v16 }
  0xfc   :  { %179 = shalt.err (!%p176_p6)
}
  0xfd   :  { %s180_s11 = scalar_lea.hbm %s254_s2, 128 }
  0xfe   :  { %p181_p7 = scmp.ne.s32.totalorder %s254_s2, %s180_s11  ;;  %p184_p8 = scmp.lt.u32.totalorder %s180_s11, %s254_s2 }
 0x100   :  { %p186_p9 = pnand %p184_p8, %p181_p7 }
 0x102   :  { %189 = shalt.err (!%p186_p9)
}
 0x103   :  { %106 = dma.vmem_to_hbm [thread:$0]  %s104_s6, 128, %s254_s2, [#allocation5]  }
 0x104   :  { %194 = dma.done.wait [#allocation5], 128  }
 0x105   :  { %195 = vsyncadd [#allocation5], 4294967168 }
 0x106   :  { %110 = vsyncpa [#allocation4], 1 }
 0x107   :  { %111 = vsyncpa [#allocation7], 1 }
 0x108   :  { %112 = vsyncpa [#allocation5], 1 }

</bundles_post_ra>
